<compile_context>
chip_gen: v7x
topology: tpu7x:2x2x1
jax: 0.10.0
libtpu: 0.0.40
codegen_flags: <defaults>
</compile_context>

<pallas_src>
import jax
import jax.numpy as jnp
import numpy as np
from jax.experimental import pallas as pl
from jax.experimental.pallas import tpu as pltpu


def _round_up(x, m):
    return (x + m - 1) // m * m


def residual_block_kernel(xp_ref, w1_ref, b1_ref, w2_ref, b2_ref, out_ref, y1p_ref):
    """Fused ResidualBlock for a block of B images (grid iterates over N // B).

    xp_ref : (B, H+2, Kp)   zero-padded input, (w, c) packed on lanes, lane-padded to Kp
    w1_ref : (3*Kp, Kp)     banded conv1 weights (BN1 folded), dy taps stacked on rows
    b1_ref : (1, Kp)        conv1 folded bias (zero on border / pad lanes)
    w2_ref : (3*Kp, Kp)     banded conv2 weights (BN2 folded), dy taps stacked on rows
    b2_ref : (1, Kp)        conv2 folded bias
    out_ref: (B, H, Kp)     output in the padded packed layout
    y1p_ref: (B, H+2, Kp)   VMEM scratch: zero-padded conv1 output
    """
    B, Hp2, Kp = xp_ref.shape
    H = Hp2 - 2
    M = B * H

    # Zero only the top/bottom padding rows of the intermediate; the interior rows
    # (including left/right border and lane-pad columns, via zero weight/bias
    # columns followed by ReLU) are fully overwritten on EVERY grid step, so grid
    # iterations stay independent and "parallel" over the batch axis is safe
    # (do not hoist this behind pl.when(program_id == 0)).
    zrow = jnp.zeros((B, 1, Kp), jnp.float32)
    y1p_ref[:, 0:1, :] = zrow
    y1p_ref[:, H + 1:H + 2, :] = zrow

    x = xp_ref[...]

    # ---- conv1 (3x3, pad 1) + folded BN1 + ReLU: single (M, 3Kp) @ (3Kp, Kp) matmul.
    xcat = jnp.concatenate(
        [x[:, 0:H, :], x[:, 1:H + 1, :], x[:, 2:H + 2, :]], axis=-1
    ).reshape(M, 3 * Kp)
    y1 = jnp.dot(xcat, w1_ref[...], preferred_element_type=jnp.float32) + b1_ref[...]
    y1p_ref[:, 1:H + 1, :] = jnp.maximum(y1, 0.0).reshape(B, H, Kp)

    # ---- conv2 (3x3, pad 1) + folded BN2 + residual + ReLU.
    y1p = y1p_ref[...]
    ycat = jnp.concatenate(
        [y1p[:, 0:H, :], y1p[:, 1:H + 1, :], y1p[:, 2:H + 2, :]], axis=-1
    ).reshape(M, 3 * Kp)
    acc2 = jnp.dot(ycat, w2_ref[...], preferred_element_type=jnp.float32) + b2_ref[...]
    residual = x[:, 1:H + 1, :].reshape(M, Kp)      # Cin == Cout => same packed layout
    out_ref[...] = jnp.maximum(acc2 + residual, 0.0).reshape(B, H, Kp)


def residual_block_nhwc(x, w1b, b1b, w2b, b2b):
    """NHWC-native entry point. x: (N, H, W, C) f32; w*b / b*b from build_banded()."""
    N, H, W, C = x.shape
    Wp = W + 2
    Kp = w1b.shape[1]                     # lane-padded packed width (multiple of 128)
    Cout = C                              # stride=1, no downsample => Cin == Cout

    # Per-step image block: keep the grid length even (>=2 steps) when possible so
    # the "parallel" batch axis shards across both v7x TensorCores; on v5e/v6e
    # (single TC) fewer, bigger steps just amortize the ~0.35 us per-step overhead.
    B_blk = N // 2 if (N >= 2 and N % 2 == 0) else N
    grid_n = N // B_blk

    xp = jnp.pad(x, ((0, 0), (1, 1), (1, 1), (0, 0)))            # conv padding = 1
    xp = xp.reshape(N, H + 2, Wp * C)                            # pack (w, c) on lanes
    xp = jnp.pad(xp, ((0, 0), (0, 0), (0, Kp - Wp * C)))         # lane-pad to 128 mult

    out_packed = pl.pallas_call(
        residual_block_kernel,
        out_shape=jax.ShapeDtypeStruct((N, H, Kp), jnp.float32),
        grid_spec=pltpu.PrefetchScalarGridSpec(
            num_scalar_prefetch=0,
            grid=(grid_n,),
            in_specs=[
                pl.BlockSpec((B_blk, H + 2, Kp), lambda n: (n, 0, 0)),
                # Constant index_map => weights/bias fetched once, resident across steps.
                pl.BlockSpec((3 * Kp, Kp), lambda n: (0, 0)),
                pl.BlockSpec((1, Kp), lambda n: (0, 0)),
                pl.BlockSpec((3 * Kp, Kp), lambda n: (0, 0)),
                pl.BlockSpec((1, Kp), lambda n: (0, 0)),
            ],
            out_specs=pl.BlockSpec((B_blk, H, Kp), lambda n: (n, 0, 0)),
            scratch_shapes=[pltpu.VMEM((B_blk, H + 2, Kp), jnp.float32)],
        ),
        compiler_params=pltpu.CompilerParams(
            dimension_semantics=("parallel",),
        ),
    )(xp, w1b, b1b, w2b, b2b)

    # Drop border + lane-pad columns.
    # TODO(synk): when chaining residual blocks, keep the padded packed layout
    # between blocks to avoid this crop / re-pad HBM round trip.
    out = out_packed[:, :, :Wp * Cout].reshape(N, H, Wp, Cout)[:, :, 1:W + 1, :]
    return out


@jax.jit
def residual_block(x_nchw, w1b, b1b, w2b, b2b):
    """NCHW wrapper matching the PyTorch module interface (transpose only here)."""
    x = jnp.transpose(x_nchw, (0, 2, 3, 1))
    out = residual_block_nhwc(x, w1b, b1b, w2b, b2b)
    return jnp.transpose(out, (0, 3, 1, 2))


def fold_conv_bn(w_oihw, b_conv, gamma, beta, mean, var, eps=1e-5):
    """Fold eval-mode BatchNorm into conv weights/bias.

    Returns HWIO weights (3, 3, Cin, Cout) and bias (Cout,), as numpy arrays.
    """
    w_oihw, b_conv, gamma, beta, mean, var = map(
        np.asarray, (w_oihw, b_conv, gamma, beta, mean, var))
    scale = gamma / np.sqrt(var + eps)                          # (Cout,)
    w_hwio = np.transpose(w_oihw, (2, 3, 1, 0)) * scale         # (3,3,Cin,Cout)
    b = (b_conv - mean) * scale + beta
    return w_hwio.astype(np.float32), b.astype(np.float32)


def build_banded(w_hwio, bias, W):
    """3x3 conv (pad=1, stride=1) + bias -> banded matmul operands.

    Returns
      wcat: (3*Kp_in, Kp_out) f32 — the three per-dy banded matrices stacked on rows,
            so conv_rows = concat_dy(x_padded_rows[h+dy]) @ wcat + bcat.
      bcat: (1, Kp_out).
    Packed lane layout is (padded_width, channel), lane-padded up to a multiple of
    128. Border (padding) output columns and lane-pad columns carry zero weights and
    zero bias.
    """
    Cin, Cout = w_hwio.shape[2], w_hwio.shape[3]
    Wp = W + 2
    Kp_in = _round_up(Wp * Cin, 128)
    Kp_out = _round_up(Wp * Cout, 128)
    wb = np.zeros((3, Kp_in, Kp_out), np.float32)
    for dy in range(3):
        for dx in range(3):
            for w in range(W):
                r0 = (w + dx) * Cin            # input pixel (padded col w+dx)
                c0 = (w + 1) * Cout            # output pixel (padded col w+1)
                wb[dy, r0:r0 + Cin, c0:c0 + Cout] = w_hwio[dy, dx]
    bb = np.zeros((Kp_out,), np.float32)
    bb[Cout:(W + 1) * Cout] = np.tile(bias, W)
    return jnp.asarray(wb.reshape(3 * Kp_in, Kp_out)), jnp.asarray(bb.reshape(1, -1))


def reference_forward(x_nchw, w1_hwio, b1, w2_hwio, b2):
    """Pure-JAX reference (same folded params) for the correctness check."""
    x = jnp.transpose(x_nchw, (0, 2, 3, 1))

    def conv(inp, w, b):
        y = jax.lax.conv_general_dilated(
            inp, jnp.asarray(w), window_strides=(1, 1), padding="SAME",
            dimension_numbers=("NHWC", "HWIO", "NHWC"))
        return y + jnp.asarray(b).reshape(1, 1, 1, -1)

    y1 = jnp.maximum(conv(x, w1_hwio, b1), 0.0)
    out = jnp.maximum(conv(y1, w2_hwio, b2) + x, 0.0)
    return jnp.transpose(out, (0, 3, 1, 2))


if __name__ == "__main__":
    # Small shapes implied by the module (stride=1, downsample=None => Cin == Cout).
    N, C, H, W = 2, 4, 16, 16
    key = jax.random.PRNGKey(0)
    keys = jax.random.split(key, 12)

    x = jax.random.normal(keys[0], (N, C, H, W), jnp.float32)

    # Deterministic synthetic parameters (PyTorch shapes).
    w1_oihw = 0.1 * jax.random.normal(keys[1], (C, C, 3, 3), jnp.float32)
    b1_conv = 0.1 * jax.random.normal(keys[2], (C,), jnp.float32)
    g1 = 1.0 + 0.1 * jax.random.normal(keys[3], (C,), jnp.float32)
    be1 = 0.1 * jax.random.normal(keys[4], (C,), jnp.float32)
    m1 = 0.1 * jax.random.normal(keys[5], (C,), jnp.float32)
    v1 = 0.5 + jax.random.uniform(keys[6], (C,), jnp.float32)

    w2_oihw = 0.1 * jax.random.normal(keys[7], (C, C, 3, 3), jnp.float32)
    b2_conv = 0.1 * jax.random.normal(keys[8], (C,), jnp.float32)
    g2 = 1.0 + 0.1 * jax.random.normal(keys[9], (C,), jnp.float32)
    be2 = 0.1 * jax.random.normal(keys[10], (C,), jnp.float32)
    m2 = 0.1 * jax.random.normal(keys[11], (C,), jnp.float32)
    v2 = 0.5 + jax.random.uniform(key, (C,), jnp.float32)

    w1_hwio, b1f = fold_conv_bn(w1_oihw, b1_conv, g1, be1, m1, v1)
    w2_hwio, b2f = fold_conv_bn(w2_oihw, b2_conv, g2, be2, m2, v2)

    w1b, b1b = build_banded(w1_hwio, b1f, W)
    w2b, b2b = build_banded(w2_hwio, b2f, W)

    out = jax.block_until_ready(residual_block(x, w1b, b1b, w2b, b2b))
    ref = jax.block_until_ready(reference_forward(x, w1_hwio, b1f, w2_hwio, b2f))

    assert out.shape == (N, C, H, W)
    assert jnp.allclose(out, ref, rtol=1e-4, atol=1e-4), "mismatch vs JAX reference"

    print("KERNEL_OK")
</pallas_src>

<mosaic_0001>
module attributes {stable_mosaic.version = 11 : i64} {
  func.func @residual_block_kernel(%arg0: i32, %arg1: memref<1x18x128xf32, #tpu.memory_space<vmem>>, %arg2: memref<384x128xf32, #tpu.memory_space<vmem>>, %arg3: memref<1x128xf32, #tpu.memory_space<vmem>>, %arg4: memref<384x128xf32, #tpu.memory_space<vmem>>, %arg5: memref<1x128xf32, #tpu.memory_space<vmem>>, %arg6: memref<1x16x128xf32, #tpu.memory_space<vmem>>, %arg7: memref<1x18x128xf32, #tpu.memory_space<vmem>>) attributes {dimension_semantics = [#tpu.dimension_semantics<parallel>], iteration_bounds = array<i64: 2>, scalar_prefetch = 0 : i64, scratch_operands = 1 : i64, tpu.core_type = #tpu.core_type<tc>, window_params = [{transform_indices = @transform_0, window_bounds = array<i64: 1, 18, 128>}, {pipeline_mode = #tpu.pipeline_mode<synchronous>, transform_indices = @transform_1, window_bounds = array<i64: 384, 128>}, {pipeline_mode = #tpu.pipeline_mode<synchronous>, transform_indices = @transform_2, window_bounds = array<i64: 1, 128>}, {pipeline_mode = #tpu.pipeline_mode<synchronous>, transform_indices = @transform_3, window_bounds = array<i64: 384, 128>}, {pipeline_mode = #tpu.pipeline_mode<synchronous>, transform_indices = @transform_4, window_bounds = array<i64: 1, 128>}, {transform_indices = @transform_5, window_bounds = array<i64: 1, 16, 128>}]} {
    %cst = arith.constant 0.000000e+00 : f32
    %0 = vector.broadcast %cst : f32 to vector<1x1x128xf32>
    %c0 = arith.constant 0 : index
    %c0_0 = arith.constant 0 : index
    %c0_1 = arith.constant 0 : index
    %1 = vector.load %arg7[%c0, %c0_0, %c0_1] : memref<1x18x128xf32, #tpu.memory_space<vmem>>, vector<1x1x128xf32>
    tpu.vector_store %arg7[%c0, %c0_0, %c0_1], %0 {strides = array<i32>} : memref<1x18x128xf32, #tpu.memory_space<vmem>>, vector<1x1x128xf32>,
    %c0_2 = arith.constant 0 : index
    %c17 = arith.constant 17 : index
    %c0_3 = arith.constant 0 : index
    %2 = vector.load %arg7[%c0_2, %c17, %c0_3] : memref<1x18x128xf32, #tpu.memory_space<vmem>>, vector<1x1x128xf32>
    tpu.vector_store %arg7[%c0_2, %c17, %c0_3], %0 {strides = array<i32>} : memref<1x18x128xf32, #tpu.memory_space<vmem>>, vector<1x1x128xf32>,
    %c0_4 = arith.constant 0 : index
    %c0_5 = arith.constant 0 : index
    %c0_6 = arith.constant 0 : index
    %3 = vector.load %arg1[%c0_4, %c0_5, %c0_6] : memref<1x18x128xf32, #tpu.memory_space<vmem>>, vector<1x18x128xf32>
    %4 = vector.extract_strided_slice %3 {offsets = [0, 0, 0], sizes = [1, 16, 128], strides = [1, 1, 1]} : vector<1x18x128xf32> to vector<1x16x128xf32>
    %5 = vector.extract_strided_slice %3 {offsets = [0, 1, 0], sizes = [1, 16, 128], strides = [1, 1, 1]} : vector<1x18x128xf32> to vector<1x16x128xf32>
    %6 = vector.extract_strided_slice %3 {offsets = [0, 2, 0], sizes = [1, 16, 128], strides = [1, 1, 1]} : vector<1x18x128xf32> to vector<1x16x128xf32>
    %7 = tpu.concatenate %4, %5, %6 in 2 : vector<1x16x128xf32>, vector<1x16x128xf32>, vector<1x16x128xf32> -> vector<1x16x384xf32>
    %8 = vector.shape_cast %7 : vector<1x16x384xf32> to vector<16x384xf32>
    %c0_7 = arith.constant 0 : index
    %c0_8 = arith.constant 0 : index
    %9 = vector.load %arg2[%c0_7, %c0_8] : memref<384x128xf32, #tpu.memory_space<vmem>>, vector<384x128xf32>
    %cst_9 = arith.constant dense<0.000000e+00> : vector<16x128xf32>
    %10 = tpu.matmul %8, %9, %cst_9 {dimension_numbers = #tpu.dot_dimension_numbers<[1], [0], [0], [1], [0, 0, 1, 1], [], []>} : vector<16x384xf32>, vector<384x128xf32>, vector<16x128xf32> -> vector<16x128xf32>
    %c0_10 = arith.constant 0 : index
    %c0_11 = arith.constant 0 : index
    %11 = vector.load %arg3[%c0_10, %c0_11] : memref<1x128xf32, #tpu.memory_space<vmem>>, vector<1x128xf32>
    %12 = vector.broadcast %11 : vector<1x128xf32> to vector<16x128xf32>
    %13 = arith.addf %10, %12 : vector<16x128xf32>
    %cst_12 = arith.constant 0.000000e+00 : f32
    %14 = vector.broadcast %cst_12 : f32 to vector<16x128xf32>
    %15 = arith.maximumf %13, %14 : vector<16x128xf32>
    %16 = vector.shape_cast %15 : vector<16x128xf32> to vector<1x16x128xf32>
    %c0_13 = arith.constant 0 : index
    %c1 = arith.constant 1 : index
    %c0_14 = arith.constant 0 : index
    %17 = vector.load %arg7[%c0_13, %c1, %c0_14] : memref<1x18x128xf32, #tpu.memory_space<vmem>>, vector<1x16x128xf32>
    tpu.vector_store %arg7[%c0_13, %c1, %c0_14], %16 {strides = array<i32>} : memref<1x18x128xf32, #tpu.memory_space<vmem>>, vector<1x16x128xf32>,
    %c0_15 = arith.constant 0 : index
    %c0_16 = arith.constant 0 : index
    %c0_17 = arith.constant 0 : index
    %18 = vector.load %arg7[%c0_15, %c0_16, %c0_17] : memref<1x18x128xf32, #tpu.memory_space<vmem>>, vector<1x18x128xf32>
    %19 = vector.extract_strided_slice %18 {offsets = [0, 0, 0], sizes = [1, 16, 128], strides = [1, 1, 1]} : vector<1x18x128xf32> to vector<1x16x128xf32>
    %20 = vector.extract_strided_slice %18 {offsets = [0, 1, 0], sizes = [1, 16, 128], strides = [1, 1, 1]} : vector<1x18x128xf32> to vector<1x16x128xf32>
    %21 = vector.extract_strided_slice %18 {offsets = [0, 2, 0], sizes = [1, 16, 128], strides = [1, 1, 1]} : vector<1x18x128xf32> to vector<1x16x128xf32>
    %22 = tpu.concatenate %19, %20, %21 in 2 : vector<1x16x128xf32>, vector<1x16x128xf32>, vector<1x16x128xf32> -> vector<1x16x384xf32>
    %23 = vector.shape_cast %22 : vector<1x16x384xf32> to vector<16x384xf32>
    %c0_18 = arith.constant 0 : index
    %c0_19 = arith.constant 0 : index
    %24 = vector.load %arg4[%c0_18, %c0_19] : memref<384x128xf32, #tpu.memory_space<vmem>>, vector<384x128xf32>
    %cst_20 = arith.constant dense<0.000000e+00> : vector<16x128xf32>
    %25 = tpu.matmul %23, %24, %cst_20 {dimension_numbers = #tpu.dot_dimension_numbers<[1], [0], [0], [1], [0, 0, 1, 1], [], []>} : vector<16x384xf32>, vector<384x128xf32>, vector<16x128xf32> -> vector<16x128xf32>
    %c0_21 = arith.constant 0 : index
    %c0_22 = arith.constant 0 : index
    %26 = vector.load %arg5[%c0_21, %c0_22] : memref<1x128xf32, #tpu.memory_space<vmem>>, vector<1x128xf32>
    %27 = vector.broadcast %26 : vector<1x128xf32> to vector<16x128xf32>
    %28 = arith.addf %25, %27 : vector<16x128xf32>
    %29 = vector.extract_strided_slice %3 {offsets = [0, 1, 0], sizes = [1, 16, 128], strides = [1, 1, 1]} : vector<1x18x128xf32> to vector<1x16x128xf32>
    %30 = vector.shape_cast %29 : vector<1x16x128xf32> to vector<16x128xf32>
    %31 = arith.addf %28, %30 : vector<16x128xf32>
    %cst_23 = arith.constant 0.000000e+00 : f32
    %32 = vector.broadcast %cst_23 : f32 to vector<16x128xf32>
    %33 = arith.maximumf %31, %32 : vector<16x128xf32>
    %34 = vector.shape_cast %33 : vector<16x128xf32> to vector<1x16x128xf32>
    %c0_24 = arith.constant 0 : index
    %c0_25 = arith.constant 0 : index
    %c0_26 = arith.constant 0 : index
    %35 = vector.load %arg6[%c0_24, %c0_25, %c0_26] : memref<1x16x128xf32, #tpu.memory_space<vmem>>, vector<1x16x128xf32>
    tpu.vector_store %arg6[%c0_24, %c0_25, %c0_26], %34 {strides = array<i32>} : memref<1x16x128xf32, #tpu.memory_space<vmem>>, vector<1x16x128xf32>,
    return
  }
  func.func @transform_0(%arg0: i32) -> (i32, i32, i32) {
    %c0_i32 = arith.constant 0 : i32
    %c0_i32_0 = arith.constant 0 : i32
    %c0_i32_1 = arith.constant 0 : i32
    return %arg0, %c0_i32, %c0_i32_0 : i32, i32, i32
  }
  func.func @transform_1(%arg0: i32) -> (i32, i32) {
    %c0_i32 = arith.constant 0 : i32
    %c0_i32_0 = arith.constant 0 : i32
    %c0_i32_1 = arith.constant 0 : i32
    return %c0_i32, %c0_i32_0 : i32, i32
  }
  func.func @transform_2(%arg0: i32) -> (i32, i32) {
    %c0_i32 = arith.constant 0 : i32
    %c0_i32_0 = arith.constant 0 : i32
    %c0_i32_1 = arith.constant 0 : i32
    return %c0_i32, %c0_i32_0 : i32, i32
  }
  func.func @transform_3(%arg0: i32) -> (i32, i32) {
    %c0_i32 = arith.constant 0 : i32
    %c0_i32_0 = arith.constant 0 : i32
    %c0_i32_1 = arith.constant 0 : i32
    return %c0_i32, %c0_i32_0 : i32, i32
  }
  func.func @transform_4(%arg0: i32) -> (i32, i32) {
    %c0_i32 = arith.constant 0 : i32
    %c0_i32_0 = arith.constant 0 : i32
    %c0_i32_1 = arith.constant 0 : i32
    return %c0_i32, %c0_i32_0 : i32, i32
  }
  func.func @transform_5(%arg0: i32) -> (i32, i32, i32) {
    %c0_i32 = arith.constant 0 : i32
    %c0_i32_0 = arith.constant 0 : i32
    %c0_i32_1 = arith.constant 0 : i32
    return %arg0, %c0_i32, %c0_i32_0 : i32, i32, i32
  }
}

</mosaic_0001>

<bundles_post_ra>
// kernel: residual_block.1
= control target key start
LH: loop header
LB: loop body
LE: loop exit
PB: predicated region body
PF: predicated region fallthrough
CT: control target
= control target key end

     0   :  { %s1116_s18 = smov 0   ;;  %s1476_s0 = inlined_call_operand.vmem [shape: f32[2,18,128], index: 0, kind: input, shape index: {}]   ;;  %s1477_s1 = inlined_call_operand.vmem [shape: f32[384,128], index: 1, kind: input, shape index: {}]   ;;  %s1478_s2 = inlined_call_operand.vmem [shape: f32[1,128], index: 2, kind: input, shape index: {}]   ;;  %s1479_s3 = inlined_call_operand.vmem [shape: f32[384,128], index: 3, kind: input, shape index: {}]   ;;  %s1480_s4 = inlined_call_operand.vmem [shape: f32[1,128], index: 4, kind: input, shape index: {}]   ;;  %s1481_s5 = inlined_call_operand.vmem [shape: f32[2,16,128], index: 5, kind: output, shape index: {}]  }
   0x1 LB: > { %s744_s19 = sadd.s32 4294967295, %s1083_s18   ;;  %p748_p0 = scmp.ge.s32.totalorder %s1083_s18, 1  ;;  %s1083_s18 = sphi %s1116_s18, %s15_s18  }
   0x2   : > { %p187_p1 = scmp.lt.s32.totalorder %s1083_s18, 3 }
   0x4   : > { %p188_p2 = pnand %p748_p0, %p187_p1 }
   0x5   : > { %v265_v0 = vld [vmem:[%s1477_s1 + $0x80] sm:$0xff] (!%p188_p2)  ;;  %v266_v1 = vld [vmem:[%s1477_s1 + $0x88] sm:$0xff] (!%p188_p2)  ;;  %p1133_p3 = scmp.lt.s32.totalorder (!%p188_p2), %s744_s19, 1  ;;  %v267_v5 = vld [vmem:[%s1477_s1 + $0x90] sm:$0xff] (!%p188_p2)  ;;  %vm233_vm0 = vcmask (!%p188_p2), 1046528   ;;  %vm241_vm1 = vcmask (!%p188_p2), 1045504  }
   0x6   : > { %191 = sbr.rel (%p188_p2) target bundleno = 505 (0x1f9), region = 40  ;;  %v249_v2 = vld [vmem:[%s1477_s1] sm:$0xff] (!%p188_p2)  ;;  %v939_v3 = vpack.c.bf16 (!%p188_p2), %v266_v1, %v265_v0  ;;  %v250_v4 = vld [vmem:[%s1477_s1 + $0x8] sm:$0xff] (!%p188_p2)  ;;  %v268_v6 = vld [vmem:[%s1477_s1 + $0x98] sm:$0xff] (!%p188_p2) }
   0x7   : > { %v941_v7 = vpack.c.bf16 (!%p188_p2), %v250_v4, %v249_v2  ;;  %v943_v8 = vpack.c.bf16 (!%p188_p2), %v268_v6, %v267_v5  ;;  %v281_v9 = vld [vmem:[%s1477_s1 + $0x100] sm:$0xff] (!%p188_p2)  ;;  %v282_v10 = vld [vmem:[%s1477_s1 + $0x108] sm:$0xff] (!%p188_p2)  ;;  %v251_v11 = vld [vmem:[%s1477_s1 + $0x10] sm:$0xff] (!%p188_p2) }
   0x8   : > { %940 = vmatprep.subr.bf16.mxu0 (!%p188_p2), %v939_v3  ;;  %v971_v12 = vpack.c.bf16 (!%p188_p2), %v282_v10, %v281_v9  ;;  %v252_v13 = vld [vmem:[%s1477_s1 + $0x18] sm:$0xff] (!%p188_p2)  ;;  %v269_v14 = vld [vmem:[%s1477_s1 + $0xa0] sm:$0xff] (!%p188_p2)  ;;  %v270_v15 = vld [vmem:[%s1477_s1 + $0xa8] sm:$0xff] (!%p188_p2) }
   0x9   : > { %942 = vmatpush3.bf16.msra.mxu0 (!%p188_p2), %v941_v7  ;;  %v945_v16 = vpack.c.bf16 (!%p188_p2), %v252_v13, %v251_v11  ;;  %v283_v17 = vld [vmem:[%s1477_s1 + $0x110] sm:$0xff] (!%p188_p2)  ;;  %v284_v18 = vld [vmem:[%s1477_s1 + $0x118] sm:$0xff] (!%p188_p2)  ;;  %v947_v19 = vpack.c.bf16 (!%p188_p2), %v270_v15, %v269_v14  ;;  %v253_v21 = vld [vmem:[%s1477_s1 + $0x20] sm:$0xff] (!%p188_p2) }
   0xa   : > { %944 = vmatprep.subr.bf16.mxu0 (!%p188_p2), %v943_v8  ;;  %972 = vmatprep.subr.bf16.mxu1 (!%p188_p2), %v971_v12  ;;  %v975_v20 = vpack.c.bf16 (!%p188_p2), %v284_v18, %v283_v17  ;;  %v254_v22 = vld [vmem:[%s1477_s1 + $0x28] sm:$0xff] (!%p188_p2)  ;;  %v271_v23 = vld [vmem:[%s1477_s1 + $0xb0] sm:$0xff] (!%p188_p2)  ;;  %v272_v24 = vld [vmem:[%s1477_s1 + $0xb8] sm:$0xff] (!%p188_p2) }
   0xb   : > { %974 = vmatpush3.bf16.msra.mxu1 (!%p188_p2), %v971_v12  ;;  %v285_v25 = vld [vmem:[%s1477_s1 + $0x120] sm:$0xff] (!%p188_p2)  ;;  %v286_v26 = vld [vmem:[%s1477_s1 + $0x128] sm:$0xff] (!%p188_p2)  ;;  %v949_v28 = vpack.c.bf16 (!%p188_p2), %v254_v22, %v253_v21  ;;  %v287_v29 = vld [vmem:[%s1477_s1 + $0x130] sm:$0xff] (!%p188_p2)  ;;  %v951_v31 = vpack.c.bf16 (!%p188_p2), %v272_v24, %v271_v23 }
   0xc   : > { %976 = vmatprep.subr.bf16.mxu1 (!%p188_p2), %v975_v20  ;;  %v979_v27 = vpack.c.bf16 (!%p188_p2), %v286_v26, %v285_v25  ;;  %v288_v30 = vld [vmem:[%s1477_s1 + $0x138] sm:$0xff] (!%p188_p2)  ;;  %v255_v32 = vld [vmem:[%s1477_s1 + $0x30] sm:$0xff] (!%p188_p2)  ;;  %v273_v34 = vld [vmem:[%s1477_s1 + $0xc0] sm:$0xff] (!%p188_p2) }
   0xd   : > { %s1484_s19 = smov (!%p1133_p3, %s744_s19), 1  ;;  %946 = vmatpush3.bf16.msra.mxu0 %v945_v16  ;;  %v256_v33 = vld [vmem:[%s1477_s1 + $0x38] sm:$0xff]  ;;  %v274_v35 = vld [vmem:[%s1477_s1 + $0xc8] sm:$0xff]  ;;  %v983_v36 = vpack.c.bf16 %v288_v30, %v287_v29  ;;  %v289_v38 = vld [vmem:[%s1477_s1 + $0x140] sm:$0xff] }
   0xe   : > { %s1067_s17 = smul.u32 24, %s1484_s19  ;;  %948 = vmatprep.subr.bf16.mxu0 %v947_v19  ;;  %v953_v37 = vpack.c.bf16 %v256_v33, %v255_v32  ;;  %v290_v39 = vld [vmem:[%s1477_s1 + $0x148] sm:$0xff]  ;;  %v955_v40 = vpack.c.bf16 %v274_v35, %v273_v34  ;;  %v257_v41 = vld [vmem:[%s1477_s1 + $0x40] sm:$0xff]  ;;  %v275_v43 = vld [vmem:[%s1477_s1 + $0xd0] sm:$0xff] }
   0xf   : > { %978 = vmatpush3.bf16.msra.mxu1 %v975_v20  ;;  %v258_v42 = vld [vmem:[%s1477_s1 + $0x48] sm:$0xff]  ;;  %v276_v44 = vld [vmem:[%s1477_s1 + $0xd8] sm:$0xff]  ;;  %v987_v45 = vpack.c.bf16 %v290_v39, %v289_v38  ;;  %v291_v49 = vld [vmem:[%s1477_s1 + $0x150] sm:$0xff] }
  0x10   : > { %980 = vmatprep.subr.bf16.mxu1 %v979_v27  ;;  %s1220_s9 = scalar_lea.vmem %s1476_s0, %s1067_s17  ;;  %v957_v48 = vpack.c.bf16 %v258_v42, %v257_v41  ;;  %v292_v50 = vld [vmem:[%s1477_s1 + $0x158] sm:$0xff]  ;;  %v959_v53 = vpack.c.bf16 %v276_v44, %v275_v43  ;;  %v259_v54 = vld [vmem:[%s1477_s1 + $0x50] sm:$0xff]  ;;  %v277_v58 = vld [vmem:[%s1477_s1 + $0xe0] sm:$0xff] }
  0x11   : > { %950 = vmatpush3.bf16.msra.mxu0 %v949_v28  ;;  %v1235_v46 = vld [vmem:[%s1220_s9] sm:$0xff]  ;;  %v1238_v47 = vld [vmem:[%s1220_s9 + $0x8] sm:$0xff]  ;;  %v260_v55 = vld [vmem:[%s1477_s1 + $0x58] sm:$0xff]  ;;  %v991_v61 = vpack.c.bf16 %v292_v50, %v291_v49 }
  0x12   : > { %952 = vmatprep.subr.bf16.mxu0 %v951_v31  ;;  %v234_v51 = vrot.slane %v1235_v46, 1  ;;  %v235_v52 = vrot.slane %v1238_v47, 1  ;;  %v242_v56 = vrot.slane %v1235_v46, 2  ;;  %v243_v57 = vrot.slane %v1238_v47, 2  ;;  %v278_v59 = vld [vmem:[%s1477_s1 + $0xe8] sm:$0xff]  ;;  %v293_v0 = vld [vmem:[%s1477_s1 + $0x160] sm:$0xff] }
  0x13   : > { %982 = vmatpush3.bf16.msra.mxu1 %v979_v27  ;;  %v961_v63 = vpack.c.bf16 %v260_v55, %v259_v54  ;;  %v294_v1 = vld [vmem:[%s1477_s1 + $0x168] sm:$0xff]  ;;  %v963_v2 = vpack.c.bf16 %v278_v59, %v277_v58  ;;  %v261_v3 = vld [vmem:[%s1477_s1 + $0x60] sm:$0xff]  ;;  %v279_v5 = vld [vmem:[%s1477_s1 + $0xf0] sm:$0xff] }
  0x14   : > { %984 = vmatprep.subr.bf16.mxu1 %v983_v36  ;;  %v1265_v60 = vsel %vm233_vm0, %v234_v51, %v235_v52  ;;  %v244_v62 = vsel %vm241_vm1, %v242_v56, %v243_v57  ;;  %v262_v4 = vld [vmem:[%s1477_s1 + $0x68] sm:$0xff]  ;;  %v280_v6 = vld [vmem:[%s1477_s1 + $0xf8] sm:$0xff]  ;;  %v995_v7 = vpack.c.bf16 %v294_v1, %v293_v0  ;;  %v295_v9 = vld [vmem:[%s1477_s1 + $0x170] sm:$0xff] }
  0x15   : > { %954 = vmatpush3.bf16.msra.mxu0 %v953_v37  ;;  %368 = vmatprep.mubr.f32.mxu0 %v1265_v60  ;;  %v965_v8 = vpack.c.bf16 %v262_v4, %v261_v3  ;;  %v296_v10 = vld [vmem:[%s1477_s1 + $0x178] sm:$0xff]  ;;  %v967_v11 = vpack.c.bf16 %v280_v6, %v279_v5  ;;  %v263_v12 = vld [vmem:[%s1477_s1 + $0x70] sm:$0xff]  ;;  %v494_v15 = vld [vmem:[%s1479_s3 + $0x80] sm:$0xff]  ;;  %v1085_v3 = vmov 0.0  }
  0x16   : > { %956 = vmatprep.subr.bf16.mxu0 %v955_v40  ;;  %901 = vmatprep.mubr.f32.mxu1 %v244_v62  ;;  %v264_v13 = vld [vmem:[%s1477_s1 + $0x78] sm:$0xff]  ;;  %v229_v14 = vld [vmem:[%s1220_s9 + $0x10] sm:$0x3]  ;;  %v495_v16 = vld [vmem:[%s1479_s3 + $0x88] sm:$0xff]  ;;  %v999_v17 = vpack.c.bf16 %v296_v10, %v295_v9  ;;  %225 = vst [vmem:[#allocation2] sm:$0x1] %v1085_v3 }
  0x17   : > { %986 = vmatpush3.bf16.msra.mxu1 %v983_v36  ;;  %v969_v18 = vpack.c.bf16 %v264_v13, %v263_v12  ;;  %v510_v19 = vld [vmem:[%s1479_s3 + $0x100] sm:$0xff]  ;;  %v511_v20 = vld [vmem:[%s1479_s3 + $0x108] sm:$0xff]  ;;  %v237_v21 = vrot.slane %v229_v14, 1  ;;  %v1003_v22 = vpack.c.bf16 %v495_v16, %v494_v15  ;;  %v245_v25 = vrot.slane %v229_v14, 2  ;;  %v496_v26 = vld [vmem:[%s1479_s3 + $0x90] sm:$0xff]  ;;  %s756_s9 = sshll.u32 %s1484_s19, 4 }
  0x18   : > { %988 = vmatprep.subr.bf16.mxu1 %v987_v45  ;;  %v478_v23 = vld [vmem:[%s1479_s3] sm:$0xff]  ;;  %v479_v24 = vld [vmem:[%s1479_s3 + $0x8] sm:$0xff]  ;;  %v497_v27 = vld [vmem:[%s1479_s3 + $0x98] sm:$0xff]  ;;  %v1035_v28 = vpack.c.bf16 %v511_v20, %v510_v19  ;;  %226 = vst [vmem:[#allocation2 + $0x11] sm:$0x1] %v1085_v3  ;;  %s224_s16 = scalar_lea.vmem %s1481_s5, %s756_s9 }
  0x19   : > { %958 = vmatpush3.bf16.msra.mxu0 %v957_v48  ;;  %v1005_v29 = vpack.c.bf16 %v479_v24, %v478_v23  ;;  %v512_v30 = vld [vmem:[%s1479_s3 + $0x110] sm:$0xff]  ;;  %v513_v31 = vld [vmem:[%s1479_s3 + $0x118] sm:$0xff]  ;;  %v1335_v32 = vsel %vm233_vm0, %v235_v52, %v237_v21  ;;  %v1007_v33 = vpack.c.bf16 %v497_v27, %v496_v26  ;;  %v246_v36 = vsel %vm241_vm1, %v243_v57, %v245_v25  ;;  %v498_v39 = vld [vmem:[%s1479_s3 + $0xa0] sm:$0xff] }
  0x1a   : > { %960 = vmatprep.subr.bf16.mxu0 %v959_v53  ;;  %v480_v34 = vld [vmem:[%s1479_s3 + $0x10] sm:$0xff]  ;;  %v481_v35 = vld [vmem:[%s1479_s3 + $0x18] sm:$0xff]  ;;  %v1039_v37 = vpack.c.bf16 %v513_v31, %v512_v30  ;;  %v499_v40 = vld [vmem:[%s1479_s3 + $0xa8] sm:$0xff] }
  0x1b   : > { %990 = vmatpush3.bf16.msra.mxu1 %v987_v45  ;;  %v1009_v38 = vpack.c.bf16 %v481_v35, %v480_v34  ;;  %v514_v41 = vld [vmem:[%s1479_s3 + $0x120] sm:$0xff]  ;;  %v1011_v42 = vpack.c.bf16 %v499_v40, %v498_v39  ;;  %v515_v43 = vld [vmem:[%s1479_s3 + $0x128] sm:$0xff]  ;;  %v500_v48 = vld [vmem:[%s1479_s3 + $0xb0] sm:$0xff] }
  0x1c   : > { %992 = vmatprep.subr.bf16.mxu1 %v991_v61  ;;  %v482_v44 = vld [vmem:[%s1479_s3 + $0x20] sm:$0xff]  ;;  %v483_v45 = vld [vmem:[%s1479_s3 + $0x28] sm:$0xff]  ;;  %v501_v49 = vld [vmem:[%s1479_s3 + $0xb8] sm:$0xff] }
  0x1d   : > { %962 = vmatpush3.bf16.msra.mxu0 %v961_v63  ;;  %v1015_v50 = vpack.c.bf16 %v501_v49, %v500_v48  ;;  %v516_v51 = vld [vmem:[%s1479_s3 + $0x130] sm:$0xff]  ;;  %v517_v52 = vld [vmem:[%s1479_s3 + $0x138] sm:$0xff]  ;;  %v502_v57 = vld [vmem:[%s1479_s3 + $0xc0] sm:$0xff] }
  0x1e   : > { %964 = vmatprep.subr.bf16.mxu0 %v963_v2  ;;  %v484_v53 = vld [vmem:[%s1479_s3 + $0x30] sm:$0xff]  ;;  %v1047_v54 = vpack.c.bf16 %v517_v52, %v516_v51  ;;  %v485_v55 = vld [vmem:[%s1479_s3 + $0x38] sm:$0xff]  ;;  %v503_v58 = vld [vmem:[%s1479_s3 + $0xc8] sm:$0xff] }
  0x1f   : > { %994 = vmatpush3.bf16.msra.mxu1 %v991_v61  ;;  %v1017_v56 = vpack.c.bf16 %v485_v55, %v484_v53  ;;  %v518_v59 = vld [vmem:[%s1479_s3 + $0x140] sm:$0xff]  ;;  %v1019_v61 = vpack.c.bf16 %v503_v58, %v502_v57  ;;  %v519_v62 = vld [vmem:[%s1479_s3 + $0x148] sm:$0xff]  ;;  %v504_v4 = vld [vmem:[%s1479_s3 + $0xd0] sm:$0xff] }
  0x20   : > { %996 = vmatprep.subr.bf16.mxu1 %v995_v7  ;;  %v486_v63 = vld [vmem:[%s1479_s3 + $0x40] sm:$0xff]  ;;  %v487_v0 = vld [vmem:[%s1479_s3 + $0x48] sm:$0xff]  ;;  %v1051_v1 = vpack.c.bf16 %v519_v62, %v518_v59  ;;  %v505_v5 = vld [vmem:[%s1479_s3 + $0xd8] sm:$0xff] }
  0x21   : > { %966 = vmatpush3.bf16.msra.mxu0 %v965_v8  ;;  %v1021_v2 = vpack.c.bf16 %v487_v0, %v486_v63  ;;  %v520_v6 = vld [vmem:[%s1479_s3 + $0x150] sm:$0xff]  ;;  %v521_v8 = vld [vmem:[%s1479_s3 + $0x158] sm:$0xff]  ;;  %v506_v13 = vld [vmem:[%s1479_s3 + $0xe0] sm:$0xff] }
  0x22   : > { %968 = vmatprep.subr.bf16.mxu0 %v967_v11  ;;  %v488_v9 = vld [vmem:[%s1479_s3 + $0x50] sm:$0xff]  ;;  %v489_v10 = vld [vmem:[%s1479_s3 + $0x58] sm:$0xff]  ;;  %v1055_v11 = vpack.c.bf16 %v521_v8, %v520_v6  ;;  %v507_v14 = vld [vmem:[%s1479_s3 + $0xe8] sm:$0xff] }
  0x23   : > { %998 = vmatpush3.bf16.msra.mxu1 %v995_v7  ;;  %v1023_v7 = vpack.c.bf16 %v505_v5, %v504_v4  ;;  %v1025_v12 = vpack.c.bf16 %v489_v10, %v488_v9  ;;  %v522_v15 = vld [vmem:[%s1479_s3 + $0x160] sm:$0xff]  ;;  %v1027_v16 = vpack.c.bf16 %v507_v14, %v506_v13  ;;  %v491_v19 = vld [vmem:[%s1479_s3 + $0x68] sm:$0xff]  ;;  %v509_v23 = vld [vmem:[%s1479_s3 + $0xf8] sm:$0xff] }
  0x24   : > { %1000 = vmatprep.subr.bf16.mxu1 %v999_v17  ;;  %v524_v24 = vld [vmem:[%s1479_s3 + $0x170] sm:$0xff]  ;;  %v525_v26 = vld [vmem:[%s1479_s3 + $0x178] sm:$0xff]  ;;  %v752_v34 = vld [vmem:[%s1478_s2] ss:$0 sm:$0xff] }
  0x25   : > { %970 = vmatpush3.bf16.msra.mxu0 %v969_v18  ;;  %v490_v18 = vld [vmem:[%s1479_s3 + $0x60] sm:$0xff]  ;;  %v492_v27 = vld [vmem:[%s1479_s3 + $0x70] sm:$0xff] }
  0x26   : > { %1004 = vmatprep.subr.bf16.mxu0 %v1003_v22  ;;  %v1029_v21 = vpack.c.bf16 %v491_v19, %v490_v18  ;;  %v508_v22 = vld [vmem:[%s1479_s3 + $0xf0] sm:$0xff]  ;;  %v753_v0 = vld [vmem:[%s1480_s4] ss:$0 sm:$0xff] }
  0x27   : > { %1002 = vmatpush3.bf16.msra.mxu1 %v999_v17  ;;  %v523_v17 = vld [vmem:[%s1479_s3 + $0x168] sm:$0xff]  ;;  %v1031_v25 = vpack.c.bf16 %v509_v23, %v508_v22 }
  0x28   : > { %369 = vmatmul.mubr.f32.vlgmr.msra.gmra.mrb[0].mxu0 %v1235_v46  ;;  %1036 = vmatprep.subr.bf16.mxu1 %v1035_v28  ;;  %v1043_v46 = vpack.c.bf16 %v515_v43, %v514_v41  ;;  %v1059_v20 = vpack.c.bf16 %v523_v17, %v522_v15 }
  0x29   : > { %373 = vmatprep.mubr.f32.mxu0 %v1335_v32  ;;  %1006 = vmatpush3.bf16.msra.mxu0 %v1005_v29  ;;  %v1063_v29 = vpack.c.bf16 %v525_v26, %v524_v24 }
  0x2a   : > { %902 = vmatmul.mubr.f32.vlgmr.msra.gmra.mrb[0].mxu1 %v246_v36  ;;  %1008 = vmatprep.subr.bf16.mxu0 %v1007_v33 }
  0x2b   : > { %1038 = vmatpush3.bf16.msra.mxu1 %v1035_v28  ;;  %v493_v28 = vld [vmem:[%s1479_s3 + $0x78] sm:$0xff] }
  0x2c   : > { %374 = vmatmul.mubr.f32.gmra.mrb[2].mxu0 %v1238_v47  ;;  %1040 = vmatprep.subr.bf16.mxu1 %v1039_v37  ;;  %v1013_v47 = vpack.c.bf16 %v483_v45, %v482_v44  ;;  %v1033_v30 = vpack.c.bf16 %v493_v28, %v492_v27 }
  0x2d   : > { %1010 = vmatpush3.bf16.msra.mxu0 %v1009_v38 }
  0x2e   : > { %1012 = vmatprep.subr.bf16.mxu0 %v1011_v42 }
  0x2f   : > { %1042 = vmatpush3.bf16.msra.mxu1 %v1039_v37 }
  0x30   : > { %1044 = vmatprep.subr.bf16.mxu1 %v1043_v46 }
  0x31   : > { %1014 = vmatpush3.bf16.msra.mxu0 %v1013_v47 }
  0x32   : > { %1016 = vmatprep.subr.bf16.mxu0 %v1015_v50 }
  0x33   : > { %1046 = vmatpush3.bf16.msra.mxu1 %v1043_v46 }
  0x34   : > { %1048 = vmatprep.subr.bf16.mxu1 %v1047_v54 }
  0x35   : > { %1018 = vmatpush3.bf16.msra.mxu0 %v1017_v56 }
  0x36   : > { %1020 = vmatprep.subr.bf16.mxu0 %v1019_v61 }
  0x37   : > { %1050 = vmatpush3.bf16.msra.mxu1 %v1047_v54 }
  0x38   : > { %1052 = vmatprep.subr.bf16.mxu1 %v1051_v1 }
  0x39   : > { %1022 = vmatpush3.bf16.msra.mxu0 %v1021_v2 }
  0x3a   : > { %1024 = vmatprep.subr.bf16.mxu0 %v1023_v7 }
  0x3b   : > { %1054 = vmatpush3.bf16.msra.mxu1 %v1051_v1 }
  0x3c   : > { %1056 = vmatprep.subr.bf16.mxu1 %v1055_v11 }
  0x3d   : > { %1026 = vmatpush3.bf16.msra.mxu0 %v1025_v12 }
  0x3e   : > { %1028 = vmatprep.subr.bf16.mxu0 %v1027_v16 }
  0x3f   : > { %1058 = vmatpush3.bf16.msra.mxu1 %v1055_v11 }
  0x40   : > { %1060 = vmatprep.subr.bf16.mxu1 %v1059_v20 }
  0x41   : > { %1030 = vmatpush3.bf16.msra.mxu0 %v1029_v21 }
  0x42   : > { %1032 = vmatprep.subr.bf16.mxu0 %v1031_v25 }
  0x43   : > { %1062 = vmatpush3.bf16.msra.mxu1 %v1059_v20 }
  0x44   : > { %1064 = vmatprep.subr.bf16.mxu1 %v1063_v29 }
  0x45   : > { %1034 = vmatpush3.bf16.msra.mxu0 %v1033_v30 }
  0x47   : > { %1066 = vmatpush3.bf16.msra.mxu1 %v1063_v29 }
  0xfb   : > { %v789_v31 = vpop.f32.mrb[0].mxu0 }
  0xfc   : > { %v790_v33 = vpop.f32.mrb[1].mxu0 }
  0xfd   : > { %v791_v35 = vadd.f32 %v790_v33, %v789_v31  ;;  %v903_v36 = vpop.f32.mrb[0].mxu1 }
  0xfe   : > { %v445_v37 = vpop.f32.mrb[1].mxu1 }
  0xff   : > { %v792_v38 = vpop.f32.mrb[2].mxu0  ;;  %v371_v39 = vadd.f32 %v791_v35, %v752_v34 }
 0x100   : > { %v793_v40 = vpop.f32.mrb[3].mxu0 }
 0x101   : > { %v794_v41 = vadd.f32 %v793_v40, %v792_v38  ;;  %v446_v42 = vadd.f32 %v445_v37, %v371_v39 }
 0x103   : > { %v376_v43 = vadd.f32 %v794_v41, %v752_v34  ;;  %v454_v44 = vmax.f32 %v446_v42, 0.0 }
 0x105   : > { %v451_v45 = vadd.f32 %v903_v36, %v376_v43  ;;  %456 = vst [vmem:[#allocation2 + $0x1] sm:$0xff] %v454_v44 }
 0x107   : > { %v455_v46 = vmax.f32 %v451_v45, 0.0 }
 0x109   : > { %457 = vst [vmem:[#allocation2 + $0x9] sm:$0xff] %v455_v46 }
 0x10c   : > { %v458_v47 = vld [vmem:[#allocation2] sm:$0xff] }
 0x10d   : > { %v464_v49 = vrot.slane %v458_v47, 1  ;;  %v471_v50 = vrot.slane %v458_v47, 2 }
 0x110   : > { %v459_v48 = vld [vmem:[#allocation2 + $0x8] sm:$0xff]  ;;  %v460_v51 = vld [vmem:[#allocation2 + $0x10] sm:$0x3] }
 0x111   : > { %v465_v52 = vrot.slane %v459_v48, 1  ;;  %v472_v53 = vrot.slane %v459_v48, 2  ;;  %v474_v54 = vrot.slane %v460_v51, 2  ;;  %v467_v55 = vrot.slane %v460_v51, 1 }
 0x113   : > { %v466_v56 = vsel %vm233_vm0, %v464_v49, %v465_v52  ;;  %v473_v57 = vsel %vm241_vm1, %v471_v50, %v472_v53  ;;  %v475_v58 = vsel %vm241_vm1, %v472_v53, %v474_v54  ;;  %v468_v59 = vsel %vm233_vm0, %v465_v52, %v467_v55 }
 0x114   : > { %597 = vmatprep.mubr.f32.mxu0 %v466_v56  ;;  %936 = vmatprep.mubr.f32.mxu1 %v473_v57 }
 0x115   : > { %598 = vmatmul.mubr.f32.vlgmr.msra.gmra.mrb[4].mxu0 %v458_v47  ;;  %937 = vmatmul.mubr.f32.vlgmr.msra.gmra.mrb[2].mxu1 %v475_v58 }
 0x116   : > { %602 = vmatprep.mubr.f32.mxu0 %v468_v59 }
 0x119   : > { %603 = vmatmul.mubr.f32.gmra.mrb[6].mxu0 %v459_v48 }
 0x1e8   : > { %v845_v61 = vpop.f32.mrb[4].mxu0  ;;  %v938_v62 = vpop.f32.mrb[2].mxu1 }
 0x1e9   : > { %v846_v63 = vpop.f32.mrb[5].mxu0  ;;  %v674_v1 = vpop.f32.mrb[3].mxu1 }
 0x1ea   : > { %v847_v2 = vadd.f32 %v846_v63, %v845_v61 }
 0x1ec   : > { %v600_v3 = vadd.f32 %v847_v2, %v753_v0  ;;  %v848_v4 = vpop.f32.mrb[6].mxu0 }
 0x1ed   : > { %v849_v5 = vpop.f32.mrb[7].mxu0 }
 0x1ee   : > { %v675_v6 = vadd.f32 %v674_v1, %v600_v3  ;;  %v850_v7 = vadd.f32 %v849_v5, %v848_v4 }
 0x1f0   : > { %v683_v8 = vadd.f32 %v675_v6, %v1265_v60  ;;  %v605_v9 = vadd.f32 %v850_v7, %v753_v0 }
 0x1f2   : > { %v685_v10 = vmax.f32 %v683_v8, 0.0  ;;  %v680_v11 = vadd.f32 %v938_v62, %v605_v9 }
 0x1f4   : > { %687 = vst [vmem:[%s224_s16] sm:$0xff] %v685_v10  ;;  %v684_v12 = vadd.f32 %v680_v11, %v1335_v32 }
 0x1f6   : > { %v686_v13 = vmax.f32 %v684_v12, 0.0 }
 0x1f8   : > { %688 = vst [vmem:[%s224_s16 + $0x8] sm:$0xff] %v686_v13 }
 0x1f9 PF: > { %s15_s18 = sadd.s32 1, %s1083_s18  }
 0x1fa   : > { %p12_p4 = scmp.ge.s32.totalorder %s15_s18, 4  }
 0x1fc   :  { %14 = sbr.rel (!%p12_p4) target bundleno = 1 (0x1), region = 70 }

</bundles_post_ra>
